<compile_context>
chip_gen: v7x
topology: tpu7x:2x2x1
jax: 0.10.0
libtpu: 0.0.40
codegen_flags: <defaults>
</compile_context>

<pallas_src>
import functools

import jax
import jax.numpy as jnp
from jax.experimental import pallas as pl
from jax.experimental.pallas import tpu as pltpu


# --------------------------- fused one-pass kernel ---------------------------

def _se_fused_kernel(x_ref, w1s_ref, w2t_ref, o_ref):
    # x_ref:   (Bt, C, HW)  input slab, native dtype
    # w1s_ref: (C, Cr)      conv1 weight, pre-transposed, pre-scaled by 1/HW, f32
    # w2t_ref: (Cr, C)      conv2 weight, pre-transposed, f32
    # o_ref:   (Bt, C, HW)
    x = x_ref[...]                                               # loaded once

    # Squeeze: spatial sum with f32 accumulation (1/HW is folded into w1s).
    pooled = jnp.sum(x, axis=-1, dtype=jnp.float32)              # (Bt, C)

    # Excitation: 1x1 conv -> ReLU -> 1x1 conv -> sigmoid (tiny, all f32).
    h = jnp.maximum(
        jnp.dot(pooled, w1s_ref[...], preferred_element_type=jnp.float32), 0.0)
    g = jax.nn.sigmoid(
        jnp.dot(h, w2t_ref[...], preferred_element_type=jnp.float32))  # (Bt, C)

    # Scale: gate cast once to the output dtype, lane-broadcast over HW.
    o_ref[...] = x * g.astype(o_ref.dtype)[:, :, None]


# -------------------- two-pass HW-tiled fallback kernels ---------------------

def _pool_gate_kernel(x_ref, w1s_ref, w2t_ref, g_ref, acc_ref, *, hw, hw_tile):
    # x_ref: (1, C, hw_tile); g_ref: (1, C, 1) f32; acc_ref: (1, C) f32 scratch.
    j = pl.program_id(1)

    @pl.when(j == 0)
    def _init():
        acc_ref[...] = jnp.zeros_like(acc_ref)

    x = x_ref[...]
    lane = jax.lax.broadcasted_iota(jnp.int32, x.shape, 2)
    valid = (j * hw_tile + lane) < hw                 # mask the ragged last tile
    acc_ref[...] += jnp.sum(jnp.where(valid, x, jnp.zeros_like(x)),
                            axis=-1, dtype=jnp.float32)

    @pl.when(j == pl.num_programs(1) - 1)
    def _finalize():
        h = jnp.maximum(
            jnp.dot(acc_ref[...], w1s_ref[...],
                    preferred_element_type=jnp.float32), 0.0)
        g = jax.nn.sigmoid(
            jnp.dot(h, w2t_ref[...], preferred_element_type=jnp.float32))
        g_ref[...] = g[:, :, None]


def _scale_kernel(x_ref, g_ref, o_ref):
    # x_ref/o_ref: (1, C, hw_tile); g_ref: (1, C, 1) f32, broadcast over lanes.
    o_ref[...] = x_ref[...] * g_ref[...].astype(o_ref.dtype)


# ------------------------------ sizing helpers --------------------------------

def _vmem_capacity_bytes():
    try:
        cap = getattr(pltpu.get_tpu_info(), "vmem_capacity_bytes", None)
        if cap:
            return int(cap)
    except Exception:
        pass
    return 64 << 20  # conservative: assume a 64-MiB (v7x-like) part


def _vmem_budgets(override=None):
    """(double-buffer budget, vmem_limit cap) — generation aware."""
    cap = _vmem_capacity_bytes()
    if cap >= (128 << 20):           # v5e / v6e: 128 MiB per TensorCore
        buf_budget, limit_cap = 48 << 20, 96 << 20
    else:                            # v7x: 64 MiB per TensorCore
        buf_budget, limit_cap = 20 << 20, 48 << 20
    if override is not None:
        buf_budget = override
    return buf_budget, limit_cap


def _pick_block_b(batch, slab_bytes, budget, *, size_floor=2 << 20, target_steps=8):
    """Smallest batch block whose input slab is >= ~2 MiB, capped so the grid
    keeps >= target_steps steps (>= 2 when batch >= 2), and fitting 2-deep
    double-buffered in+out slabs in `budget`.  None -> take the two-pass
    fallback (a single-batch slab does not fit)."""
    divisors = [d for d in range(1, batch + 1) if batch % d == 0]
    fits = [d for d in divisors if 4 * d * slab_bytes <= budget]
    if not fits:
        return None
    floor_b = -(-size_floor // slab_bytes)            # ceil(size_floor / slab)
    step_cap = max(1, batch // target_steps)          # keep >= 8 grid steps
    two_step_cap = max(1, batch // 2)                 # never fewer than 2 steps
    want = min(two_step_cap, max(step_cap, floor_b))
    return max(d for d in fits if d <= want)          # 1 is always in fits


# --------------------------------- wrappers -----------------------------------

def _se_two_pass(x_flat, w1s, w2t, buf_budget, limit_cap):
    """Fallback when a single-batch (C, HW) slab exceeds the VMEM budget:
    pass 1 tiles HW ('arbitrary' axis) accumulating the pooled sum in VMEM
    scratch and emits the (B, C, 1) gate; pass 2 re-reads x tile-by-tile and
    applies the gate.  Costs one extra HBM read of x but never OOMs VMEM."""
    B, C, HW = x_flat.shape
    Cr = w1s.shape[1]
    itemsize = x_flat.dtype.itemsize

    # HW tile: multiple of 128, sized so double-buffered in+out tiles fit.
    max_lanes = buf_budget // (4 * C * itemsize)
    hw_tile = max(128, (max_lanes // 128) * 128)
    hw_tile = min(hw_tile, ((HW + 127) // 128) * 128)
    num_hw = pl.cdiv(HW, hw_tile)
    # TODO(synk): if even C*128*itemsize tiles exceed the budget (tens of
    # thousands of channels), the channel axis would need tiling as well.

    vmem_limit = min(limit_cap,
                     max(32 << 20, 4 * C * hw_tile * itemsize + (8 << 20)))

    gate = pl.pallas_call(
        functools.partial(_pool_gate_kernel, hw=HW, hw_tile=hw_tile),
        out_shape=jax.ShapeDtypeStruct((B, C, 1), jnp.float32),
        grid_spec=pltpu.PrefetchScalarGridSpec(
            num_scalar_prefetch=0,
            grid=(B, num_hw),
            in_specs=[
                pl.BlockSpec((1, C, hw_tile), lambda b, j: (b, 0, j)),
                pl.BlockSpec((C, Cr), lambda b, j: (0, 0)),
                pl.BlockSpec((Cr, C), lambda b, j: (0, 0)),
            ],
            out_specs=pl.BlockSpec((1, C, 1), lambda b, j: (b, 0, 0)),
            scratch_shapes=[pltpu.VMEM((1, C), jnp.float32)],
        ),
        compiler_params=pltpu.CompilerParams(
            dimension_semantics=("parallel", "arbitrary"),
            vmem_limit_bytes=vmem_limit,
        ),
        cost_estimate=pl.CostEstimate(
            flops=B * C * HW + 4 * B * C * Cr,
            transcendentals=B * C,
            bytes_accessed=B * C * HW * itemsize + B * C * 4,
        ),
    )(x_flat, w1s, w2t)

    out_flat = pl.pallas_call(
        _scale_kernel,
        out_shape=jax.ShapeDtypeStruct((B, C, HW), x_flat.dtype),
        grid_spec=pltpu.PrefetchScalarGridSpec(
            num_scalar_prefetch=0,
            grid=(B, num_hw),
            in_specs=[
                pl.BlockSpec((1, C, hw_tile), lambda b, j: (b, 0, j)),
                pl.BlockSpec((1, C, 1), lambda b, j: (b, 0, 0)),
            ],
            out_specs=pl.BlockSpec((1, C, hw_tile), lambda b, j: (b, 0, j)),
        ),
        compiler_params=pltpu.CompilerParams(
            dimension_semantics=("parallel", "parallel"),
            vmem_limit_bytes=vmem_limit,
        ),
        cost_estimate=pl.CostEstimate(
            flops=B * C * HW,
            transcendentals=0,
            bytes_accessed=2 * B * C * HW * itemsize + B * C * 4,
        ),
    )(x_flat, gate)

    return out_flat


def se_block(x, w1, w2, *, vmem_budget_bytes=None):
    """x: (B, C, H, W) NCHW; w1: (C//r, C) conv1 weight; w2: (C, C//r) conv2 weight."""
    B, C, H, W = x.shape
    HW = H * W
    Cr = w1.shape[0]
    itemsize = x.dtype.itemsize

    # No HW padding / slicing: the full HW becomes the block's last dim.
    x_flat = x.reshape(B, C, HW)

    # Wrapper-side layout plumbing: pre-transpose the 1x1-conv weights, cast
    # them to f32 once, and fold the average pool's 1/HW into the first one.
    w1s = w1.T.astype(jnp.float32) * jnp.float32(1.0 / HW)   # (C, Cr)
    w2t = w2.T.astype(jnp.float32)                           # (Cr, C)

    buf_budget, limit_cap = _vmem_budgets(vmem_budget_bytes)
    slab_bytes = C * HW * itemsize
    block_b = _pick_block_b(B, slab_bytes, buf_budget)

    if block_b is None:
        out_flat = _se_two_pass(x_flat, w1s, w2t, buf_budget, limit_cap)
    else:
        grid_b = B // block_b
        # TODO(synk): for B == 1 on v7x (2 TensorCores) this single-step grid
        # leaves one core idle; route through the two-pass HW-tiled path there
        # if that ever matters.
        vmem_limit = min(limit_cap,
                         max(32 << 20, 4 * block_b * slab_bytes + (8 << 20)))
        cost = pl.CostEstimate(
            flops=2 * B * C * HW + 4 * B * C * Cr,
            transcendentals=B * C,                      # sigmoid
            bytes_accessed=2 * B * C * HW * itemsize + (w1s.size + w2t.size) * 4,
        )
        out_flat = pl.pallas_call(
            _se_fused_kernel,
            out_shape=jax.ShapeDtypeStruct((B, C, HW), x.dtype),
            grid_spec=pltpu.PrefetchScalarGridSpec(
                num_scalar_prefetch=0,
                grid=(grid_b,),
                in_specs=[
                    pl.BlockSpec((block_b, C, HW), lambda b: (b, 0, 0)),
                    pl.BlockSpec((C, Cr), lambda b: (0, 0)),
                    pl.BlockSpec((Cr, C), lambda b: (0, 0)),
                ],
                out_specs=pl.BlockSpec((block_b, C, HW), lambda b: (b, 0, 0)),
            ),
            compiler_params=pltpu.CompilerParams(
                dimension_semantics=("parallel",),
                vmem_limit_bytes=vmem_limit,
            ),
            cost_estimate=cost,
        )(x_flat, w1s, w2t)

    return out_flat.reshape(B, C, H, W)


def se_block_ref(x, w1, w2):
    """Pure-JAX reference mirroring the PyTorch forward."""
    z = jnp.mean(x, axis=(2, 3), keepdims=True)                # (B, C, 1, 1)
    z = jnp.einsum("rc,bcij->brij", w1, z)                     # 1x1 conv, no bias
    z = jax.nn.relu(z)
    z = jnp.einsum("cr,brij->bcij", w2, z)
    z = jax.nn.sigmoid(z)
    return x * z


if __name__ == "__main__":
    key = jax.random.PRNGKey(0)
    k_x, k_w1, k_w2 = jax.random.split(key, 3)

    # in_channels=16, reduction=8 -> hidden=2; spatial 16x16; batch 2.
    B, C, H, W = 2, 16, 16, 16
    reduction = 8
    Cr = C // reduction

    x = jax.random.normal(k_x, (B, C, H, W), dtype=jnp.float32)
    # Deterministic synthetic 1x1-conv weights (bias=False).
    w1 = jax.random.normal(k_w1, (Cr, C), dtype=jnp.float32) * 0.1
    w2 = jax.random.normal(k_w2, (C, Cr), dtype=jnp.float32) * 0.1

    ref = se_block_ref(x, w1, w2)

    # Primary fused single-pass path.
    out = se_block(x, w1, w2)
    jax.block_until_ready(out)
    assert out.shape == x.shape
    err = float(jnp.max(jnp.abs(out - ref)))
    assert jnp.allclose(out, ref, atol=1e-5, rtol=1e-5), err

    # Also exercise the two-pass HW-tiled fallback by forcing a tiny budget.
    out_fb = se_block(x, w1, w2, vmem_budget_bytes=32 * 1024)
    jax.block_until_ready(out_fb)
    err_fb = float(jnp.max(jnp.abs(out_fb - ref)))
    assert jnp.allclose(out_fb, ref, atol=1e-5, rtol=1e-5), err_fb

    print("KERNEL_OK")
</pallas_src>

<mosaic_0001>
module attributes {stable_mosaic.version = 11 : i64} {
  func.func @_se_fused_kernel(%arg0: i32, %arg1: memref<1x16x256xf32, #tpu.memory_space<vmem>>, %arg2: memref<16x2xf32, #tpu.memory_space<vmem>>, %arg3: memref<2x16xf32, #tpu.memory_space<vmem>>, %arg4: memref<1x16x256xf32, #tpu.memory_space<vmem>>) attributes {dimension_semantics = [#tpu.dimension_semantics<parallel>], iteration_bounds = array<i64: 2>, scalar_prefetch = 0 : i64, scratch_operands = 0 : i64, tpu.core_type = #tpu.core_type<tc>, window_params = [{transform_indices = @transform_0, window_bounds = array<i64: 1, 16, 256>}, {pipeline_mode = #tpu.pipeline_mode<synchronous>, transform_indices = @transform_1, window_bounds = array<i64: 16, 2>}, {pipeline_mode = #tpu.pipeline_mode<synchronous>, transform_indices = @transform_2, window_bounds = array<i64: 2, 16>}, {transform_indices = @transform_3, window_bounds = array<i64: 1, 16, 256>}]} {
    %c0 = arith.constant 0 : index
    %c0_0 = arith.constant 0 : index
    %c0_1 = arith.constant 0 : index
    %0 = vector.load %arg1[%c0, %c0_0, %c0_1] : memref<1x16x256xf32, #tpu.memory_space<vmem>>, vector<1x16x256xf32>
    %cst = arith.constant dense<0.000000e+00> : vector<1x16xf32>
    %1 = vector.multi_reduction <add>, %0, %cst [2] : vector<1x16x256xf32> to vector<1x16xf32>
    %c0_2 = arith.constant 0 : index
    %c0_3 = arith.constant 0 : index
    %2 = vector.load %arg2[%c0_2, %c0_3] : memref<16x2xf32, #tpu.memory_space<vmem>>, vector<16x2xf32>
    %cst_4 = arith.constant dense<0.000000e+00> : vector<1x2xf32>
    %3 = tpu.matmul %1, %2, %cst_4 {dimension_numbers = #tpu.dot_dimension_numbers<[1], [0], [0], [1], [0, 0, 1, 1], [], []>} : vector<1x16xf32>, vector<16x2xf32>, vector<1x2xf32> -> vector<1x2xf32>
    %cst_5 = arith.constant 0.000000e+00 : f32
    %4 = vector.broadcast %cst_5 : f32 to vector<1x2xf32>
    %5 = arith.maximumf %3, %4 : vector<1x2xf32>
    %c0_6 = arith.constant 0 : index
    %c0_7 = arith.constant 0 : index
    %6 = vector.load %arg3[%c0_6, %c0_7] : memref<2x16xf32, #tpu.memory_space<vmem>>, vector<2x16xf32>
    %cst_8 = arith.constant dense<0.000000e+00> : vector<1x16xf32>
    %7 = tpu.matmul %5, %6, %cst_8 {dimension_numbers = #tpu.dot_dimension_numbers<[1], [0], [0], [1], [0, 0, 1, 1], [], []>} : vector<1x2xf32>, vector<2x16xf32>, vector<1x16xf32> -> vector<1x16xf32>
    %8 = arith.negf %7 : vector<1x16xf32>
    %9 = math.exp %8 : vector<1x16xf32>
    %cst_9 = arith.constant 1.000000e+00 : f32
    %10 = vector.broadcast %cst_9 : f32 to vector<1x16xf32>
    %11 = arith.addf %10, %9 : vector<1x16xf32>
    %12 = arith.divf %10, %11 : vector<1x16xf32>
    %13 = vector.shape_cast %12 : vector<1x16xf32> to vector<1x16x1xf32>
    %14 = vector.broadcast %13 : vector<1x16x1xf32> to vector<1x16x256xf32>
    %15 = arith.mulf %0, %14 : vector<1x16x256xf32>
    %c0_10 = arith.constant 0 : index
    %c0_11 = arith.constant 0 : index
    %c0_12 = arith.constant 0 : index
    %16 = vector.load %arg4[%c0_10, %c0_11, %c0_12] : memref<1x16x256xf32, #tpu.memory_space<vmem>>, vector<1x16x256xf32>
    tpu.vector_store %arg4[%c0_10, %c0_11, %c0_12], %15 {strides = array<i32>} : memref<1x16x256xf32, #tpu.memory_space<vmem>>, vector<1x16x256xf32>,
    return
  }
  func.func @transform_0(%arg0: i32) -> (i32, i32, i32) {
    %c0_i32 = arith.constant 0 : i32
    %c0_i32_0 = arith.constant 0 : i32
    %c0_i32_1 = arith.constant 0 : i32
    return %arg0, %c0_i32, %c0_i32_0 : i32, i32, i32
  }
  func.func @transform_1(%arg0: i32) -> (i32, i32) {
    %c0_i32 = arith.constant 0 : i32
    %c0_i32_0 = arith.constant 0 : i32
    %c0_i32_1 = arith.constant 0 : i32
    return %c0_i32, %c0_i32_0 : i32, i32
  }
  func.func @transform_2(%arg0: i32) -> (i32, i32) {
    %c0_i32 = arith.constant 0 : i32
    %c0_i32_0 = arith.constant 0 : i32
    %c0_i32_1 = arith.constant 0 : i32
    return %c0_i32, %c0_i32_0 : i32, i32
  }
  func.func @transform_3(%arg0: i32) -> (i32, i32, i32) {
    %c0_i32 = arith.constant 0 : i32
    %c0_i32_0 = arith.constant 0 : i32
    %c0_i32_1 = arith.constant 0 : i32
    return %arg0, %c0_i32, %c0_i32_0 : i32, i32, i32
  }
}

</mosaic_0001>

<bundles_post_ra>
// kernel: tpu_custom_call.1
= control target key start
LH: loop header
LB: loop body
LE: loop exit
PB: predicated region body
PF: predicated region fallthrough
CT: control target
= control target key end

     0   :  { %8 = vsyncpa [#allocation3], 0  ;;  %s880_s0 = inlined_call_operand.hbm [shape: f32[2,16,256], index: 0, kind: input, shape index: {}]   ;;  %s881_s1 = inlined_call_operand.vmem [shape: f32[16,2], index: 1, kind: input, shape index: {}]   ;;  %s882_s2 = inlined_call_operand.vmem [shape: f32[2,16], index: 2, kind: input, shape index: {}]   ;;  %s883_s3 = inlined_call_operand.hbm [shape: f32[2,16,256], index: 3, kind: output, shape index: {}]  }
   0x1   :  { %10 = vsyncpa [#allocation3 + $0x1], 0 }
   0x2   :  { %11 = vsyncpa [#allocation4], 0 }
   0x3   :  { %13 = vsyncpa [#allocation4 + $0x1], 0  ;;  %s705_s12 = smov 0   ;;  %s707_s13 = smov 0  }
   0x4   :  { %s709_s14 = smov 0   ;;  %s711_s15 = smov 0  }
   0x5 LB: > { %s726_s16 = sadd.s32 4294967295, %s674_s15   ;;  %s481_s17 = sadd.s32 4294967294, %s674_s15   ;;  %s674_s15 = sphi %s711_s15, %s896_s15   ;;  %s670_s14 = sphi %s709_s14, %s895_s14   ;;  %s666_s13 = sphi %s707_s13, %s894_s13   ;;  %s662_s12 = sphi %s705_s12, %s893_s12  }
   0x6   : > { %s730_s18 = sadd.s32 1, %s674_s15   ;;  %s26_s19 = sadd.s32 1, %s670_s14 }
   0x7   : > { %s23_s20 = ssub.s32 %s674_s15, %s730_s18  ;;  %p33_p0 = scmp.ne.s32.totalorder %s670_s14, %s666_s13 }
   0x8   : > { %p24_p1 = scmp.eq.s32.totalorder %s23_s20, 0  ;;  %p34_p2 = scmp.eq.s32.totalorder %s674_s15, 0 }
   0x9   : > { %p39_p3 = scmp.ne.s32.totalorder %s666_s13, %s662_s12  ;;  %p40_p4 = scmp.eq.s32.totalorder %s726_s16, 0 }
   0xa   : > { %s742_s21 = scalar_select %p24_p1, %s670_s14, %s26_s19  }
   0xb   : > { %p744_p5 = por %p34_p2, %p33_p0  ;;  %p748_p6 = por %p40_p4, %p39_p3 }
   0xc   : > { %p105_p7 = scmp.eq.s32.totalorder %s726_s16, 1  ;;  %p111_p8 = scmp.eq.s32.totalorder %s481_s17, 1 }
   0xd   : > { %p533_p10 = scmp.lt.s32.totalorder %s674_s15, 2  ;;  %s137_s26 = sand.u32 1, %s670_s14  }
   0xe   : > { %p755_p11 = por %p105_p7, %p33_p0  ;;  %p759_p12 = por %p111_p8, %p39_p3 }
   0xf   : > { %s499_s27 = sshll.u32 %s674_s15, 9  ;;  %s484_s28 = sshll.u32 %s137_s26, 5 }
  0x10   : > { %s887_s24 = scalar_select %p755_p11, 1, 0 }
  0x11   : > { %s888_s25 = scalar_select %p759_p12, 1, 0 }
  0x12   : > { %s768_s4 = scalar_lea.hbm %s880_s0, %s499_s27  ;;  %s141_s5 = scalar_lea.vmem [#allocation2], %s484_s28 }
  0x13   : > { %s148_s6 = sshll.u32 %s141_s5, 4  ;;  %p772_p13 = pnand %p533_p10, %p744_p5  ;;  %s776_s6 = int_to_ptr.vmem [resolvable:$true] %s148_s6 }
  0x14   : > { %s778_s8 = scalar_lea.sflag [#allocation3], %s137_s26  ;;  %s578_s9 = scalar_lea.hbm %s768_s4, 512 }
  0x15   : > { %p579_p0 = scmp.ne.s32.totalorder %s768_s4, %s578_s9  ;;  %p580_p1 = pneg %p772_p13 }
  0x16   : > { %s583_s17 = scalar_lea.hbm %s880_s0, 1024  ;;  %p584_p4 = scmp.lt.u32.totalorder %s768_s4, %s880_s0 }
  0x17   : > { %p581_p2 = pnand %p580_p1, %p579_p0  ;;  %p585_p5 = scmp.lt.u32.totalorder %s583_s17, %s578_s9 }
  0x18   : > { %p587_p8 = scmp.lt.u32.totalorder %s578_s9, %s768_s4 }
  0x19   : > { %p582_p3 = pneg %p581_p2  ;;  %p586_p7 = por %p585_p5, %p584_p4 }
  0x1b   : > { %p588_p10 = por %p587_p8, %p586_p7 }
  0x1d   : > { %p589_p9 = pnand %p588_p10, %p582_p3 }
  0x1f   : > { %592 = shalt.err (!%p589_p9)
}
  0x20   : > { %s593_s22 = scalar_lea.vmem %s776_s6, 512  ;;  %s676_s26 = smov [#allocation2]  }
  0x21   : > { %p594_p0 = scmp.ne.s32.totalorder %s776_s6, %s593_s22  ;;  %s598_s27 = sshll.u32 %s676_s26, 4  ;;  %s599_s27 = int_to_ptr.vmem [resolvable:$false] %s598_s27 }
  0x22   : > { %s600_s28 = scalar_lea.vmem %s599_s27, 1024  ;;  %p601_p11 = scmp.lt.s32.totalorder %s776_s6, %s599_s27 }
  0x23   : > { %p596_p2 = pnand %p594_p0, %p580_p1  ;;  %p602_p4 = scmp.lt.s32.totalorder %s600_s28, %s593_s22 }
  0x25   : > { %p597_p12 = pneg %p596_p2  ;;  %p603_p5 = por %p602_p4, %p601_p11 }
  0x27   : > { %p604_p7 = pnand %p603_p5, %p597_p12 }
  0x29   : > { %607 = shalt.err (!%p604_p7)
}
  0x2a   : > { %s677_s29 = smov 256   ;;  %s678_s30 = smov 16  }
  0x2b   : > { %528 = dma.hbm_to_vmem [thread:$0]  (!%p772_p13), %s768_s4, 512, %s776_s6, %s778_s8, %s677_s29, %s677_s29, %s678_s30  }
  0x2c   : > { %p487_p9 = scmp.ge.s32.totalorder %s674_s15, 1  ;;  %p156_p1 = scmp.lt.s32.totalorder %s674_s15, 3 }
  0x2e   : > { %p157_p3 = pnand %p487_p9, %p156_p1 }
  0x2f   : > { %s809_s5 = sand.u32 (!%p157_p3), 1, %s666_s13  }
  0x30   : > { %160 = sbr.rel (%p157_p3) target bundleno = 798 (0x31e), region = 32  ;;  %s488_s9 = sshll.u32 (!%p157_p3), %s809_s5, 5 }
  0x31   : > { %s163_s10 = scalar_lea.sflag (!%p157_p3), [#allocation3], %s809_s5  ;;  %s166_s11 = scalar_lea.vmem (!%p157_p3), [#allocation2], %s488_s9 }
  0x37   : > { %653 = dma.done.wait (%p748_p6), %s163_s10, 512  }
  0x38   : > { %655 = vsyncadd (%p748_p6), %s163_s10, 4294966784  ;;  %v189_v0 = vld [vmem:[%s166_s11] sm:$0xff]  ;;  %v190_v1 = vld [vmem:[%s166_s11 + $0x8] sm:$0xff]  ;;  %v679_v6 = vmov 0.0|0.0   ;;  %vm680_vm0 = vmmov 0   ;;  %v681_v10 = vmov 0.0   ;;  %v203_v11 = vlaneseq }
  0x39   : > { %v191_v2 = vld [vmem:[%s166_s11 + $0x10] sm:$0xff]  ;;  %v193_v3 = vadd.f32 %v190_v1, %v189_v0  ;;  %v192_v4 = vld [vmem:[%s166_s11 + $0x18] sm:$0xff]  ;;  %518 = vmatprep.subr.bf16.mxu0 %v679_v6  ;;  %v199_v7 = vld [vmem:[%s881_s1] sm:$0xff]  ;;  %510 = vmatprep.mubr.msk.f32.mxu0 %vm680_vm0, %v681_v10  ;;  %vm214_vm1 = vcmask 130112   ;;  %vm216_vm2 = vcmask 130048   ;;  %vm295_vm3 = vcmask 1041408  }
  0x3a   : > { %v196_v5 = vadd.f32 %v192_v4, %v191_v2  ;;  %v200_v8 = vld [vmem:[%s881_s1 + $0x8] sm:$0xff]  ;;  %513 = vmatprep.subr.mxu1 %v681_v10  ;;  %515 = vmatprep.mubr.msk.f32.mxu1 %vm680_vm0, %v681_v10  ;;  %v204_v12 = vand.u32 127, %v203_v11  ;;  %v206_v13 = vshrl.u32 %v203_v11, 7  ;;  %v290_v22 = vld [vmem:[%s882_s2] sm:$0x3]  ;;  %vm291_vm4 = vcmask 15360  }
  0x3b   : > { %194 = vadd.xlane.f32.xlu0 %v193_v3  ;;  %v519_v9 = vpack.c.bf16 %v200_v8, %v199_v7  ;;  %514 = vmatpush3.msk.msra.mxu1 %vm295_vm3, %v290_v22  ;;  %s188_s19 = scalar_lea.vmem [#allocation5], %s488_s9  ;;  %s500_s22 = sshll.u32 %s726_s16, 9 }
  0x3c   : > { %v209_v14 = vadd.s32 4294967288, %v204_v12  ;;  %v207_v16 = vsub.s32 %v204_v12, %v206_v13  ;;  %v377_v31 = vsub.s32 0, %v206_v13  ;;  %s408_s20 = sshll.u32 %s188_s19, 4  ;;  %s836_s28 = scalar_lea.hbm %s883_s3, %s500_s22  ;;  %s831_s20 = int_to_ptr.vmem [resolvable:$true] %s408_s20 }
  0x3d   : > { %520 = vmatpush3.bf16.msra.mxu0 %v519_v9  ;;  %s395_s29 = scalar_lea.sflag [#allocation4], %s809_s5  ;;  %s608_s30 = scalar_lea.vmem %s831_s20, 512 }
  0x3e   : > { %v212_v17 = vsub.s32 %v209_v14, %v206_v13  ;;  %p609_p6 = scmp.ne.s32.totalorder %s831_s20, %s608_s30  ;;  %p890_p11 = scmp.ne.s32.totalorder %s887_s24, 0 }
  0x3f   : > { %197 = vadd.xlane.f32.xlu0 %v196_v5  ;;  %s682_s16 = smov [#allocation5]  }
  0x40   : > { %p610_p12 = pnand %p609_p6, %p890_p11  ;;  %s612_s9 = sshll.u32 %s682_s16, 4  ;;  %s613_s9 = int_to_ptr.vmem [resolvable:$false] %s612_s9 }
  0x41   : > { %s614_s10 = scalar_lea.vmem %s613_s9, 1024  ;;  %p615_p8 = scmp.lt.s32.totalorder %s831_s20, %s613_s9 }
  0x42   : > { %p611_p13 = pneg %p610_p12  ;;  %p616_p10 = scmp.lt.s32.totalorder %s614_s10, %s608_s30 }
  0x44   : > { %p617_p0 = por %p616_p10, %p615_p8 }
  0x46   : > { %p618_p2 = pnand %p617_p0, %p611_p13 }
  0xc8   : > { %v195_v15 = vpop.xlane.xlu0 %194 }
  0xc9   : > { %v208_v19 = vrot.slane %v195_v15, %v207_v16 }
  0xcc   : > { %v198_v18 = vpop.xlane.xlu0 %197 }
  0xcd   : > { %v213_v20 = vrot.slane %v198_v18, %v212_v17 }
  0xcf   : > { %v215_v21 = vsel %vm214_vm1, %v213_v20, %v208_v19 }
  0xd0   : > { %511 = vmatmul.mubr.msk.f32.vlgmr.msra.gmra.mrb[0].mxu0 %vm216_vm2, %v215_v21 }
 0x1a3   : > { %v285_v23 = vpop.f32.mrb[0].mxu0 }
 0x1a4   : > { %v289_v24 = vmax.f32 %v285_v23, 0.0  ;;  %v512_v25 = vpop.f32.mrb[1].mxu0 }
 0x1a6   : > { %516 = vmatmul.mubr.msk.f32.vlgmr.msra.gmra.mrb[0].mxu1 %vm291_vm4, %v289_v24 }
 0x279   : > { %v365_v26 = vpop.f32.mrb[0].mxu1 }
 0x27a   : > { %v493_v27 = vmul.f32 -1.442695, %v365_v26  ;;  %v517_v28 = vpop.f32.mrb[1].mxu1 }
 0x27c   : > { %574 = vpow2.f32 %v493_v27 }
 0x286   : > { %v575_v29 = vpop.eup %574 }
 0x287   : > { %v372_v30 = vadd.f32 1.0, %v575_v29 }
 0x289   : > { %576 = vrcp.f32 %v372_v30 }
 0x293   : > { %v577_v32 = vpop.eup %576 }
 0x294   : > { %v378_v33 = vrot.slane %v577_v32, %v377_v31 }
 0x296   : > { %380 = vbcast.lane.b32.xlu1 %v378_v33, 256 }
 0x29a   : > { %384 = vbcast.lane.b32.xlu1 %v378_v33, 264 }
 0x308   : > { %v381_v34 = vpop.permute.xlu1 %380 }
 0x309   : > { %v386_v35 = vmul.f32 %v381_v34, %v189_v0  ;;  %v387_v36 = vmul.f32 %v381_v34, %v190_v1 }
 0x30b   : > { %390 = vst [vmem:[%s188_s19] sm:$0xff] %v386_v35  ;;  %391 = vst [vmem:[%s188_s19 + $0x8] sm:$0xff] %v387_v36 }
 0x30c   : > { %v385_v37 = vpop.permute.xlu1 %384 }
 0x30d   : > { %v388_v38 = vmul.f32 %v385_v37, %v191_v2  ;;  %v389_v39 = vmul.f32 %v385_v37, %v192_v4 }
 0x30f   : > { %392 = vst [vmem:[%s188_s19 + $0x10] sm:$0xff] %v388_v38  ;;  %393 = vst [vmem:[%s188_s19 + $0x18] sm:$0xff] %v389_v39 }
 0x310   : > { %621 = shalt.err (!%p618_p2)
}
 0x311   : > { %s622_s11 = scalar_lea.hbm %s836_s28, 512  ;;  %s626_s7 = scalar_lea.hbm %s883_s3, 1024 }
 0x312   : > { %p623_p4 = scmp.ne.s32.totalorder %s836_s28, %s622_s11  ;;  %p627_p9 = scmp.lt.u32.totalorder %s836_s28, %s883_s3 }
 0x313   : > { %p628_p1 = scmp.lt.u32.totalorder %s626_s7, %s622_s11  ;;  %p630_p6 = scmp.lt.u32.totalorder %s622_s11, %s836_s28 }
 0x314   : > { %p624_p5 = pnand %p623_p4, %p890_p11 }
 0x315   : > { %p629_p3 = por %p628_p1, %p627_p9 }
 0x316   : > { %p625_p7 = pneg %p624_p5 }
 0x317   : > { %p631_p12 = por %p630_p6, %p629_p3 }
 0x319   : > { %p632_p13 = pnand %p631_p12, %p625_p7 }
 0x31b   : > { %635 = shalt.err (!%p632_p13)
}
 0x31c   : > { %s683_s17 = smov 256   ;;  %s684_s19 = smov 16  }
 0x31d   : > { %523 = dma.vmem_to_hbm [thread:$0]  (%p890_p11), %s831_s20, 512, %s836_s28, %s395_s29, %s683_s17, %s683_s17, %s684_s19  }
 0x31e PF: > { %s423_s22 = sand.u32 1, %s662_s12   ;;  %p891_p8 = scmp.ne.s32.totalorder %s888_s25, 0 }
 0x31f   : > { %p892_p10 = scmp.ge.s32.totalorder %s674_s15, 2  ;;  %s424_s26 = scalar_lea.sflag [#allocation4], %s423_s22 }
 0x321   : > { %p530_p0 = pnand %p892_p10, %p891_p8 }
 0x323   : > { %657 = dma.done.wait (!%p530_p0), %s424_s26, 512  }
 0x324   : > { %659 = vsyncadd (!%p530_p0), %s424_s26, 4294966784  ;;  %p16_p2 = scmp.ge.s32.totalorder %s730_s18, 4   ;;  %s893_s12 = smov %s666_s13 }
 0x325   : > { %s894_s13 = smov %s670_s14  ;;  %s895_s14 = smov %s742_s21 }
 0x326   : > { %s896_s15 = smov %s730_s18  ;;  %18 = sbr.rel (!%p16_p2) target bundleno = 5 (0x5), region = 77 }
 0x32d   :  { %429 = vsyncpa [#allocation3], 1 }
 0x32e   :  { %431 = vsyncpa [#allocation3 + $0x1], 1 }
 0x32f   :  { %432 = vsyncpa [#allocation4], 1 }
 0x330   :  { %434 = vsyncpa [#allocation4 + $0x1], 1 }

</bundles_post_ra>
